<compile_context>
chip_gen: v6e
topology: v6e:2x2x1
jax: 0.10.0
libtpu: 0.0.40
codegen_flags: <defaults>
</compile_context>

<pallas_src>
import numpy as np
import jax
import jax.numpy as jnp
from jax.experimental import pallas as pl
from jax.experimental.pallas import tpu as pltpu


# ----------------------------------------------------------------------------------
# Host-side helpers
# ----------------------------------------------------------------------------------

def _interp_matrix_np(out_size, in_size, align_corners):
    """PyTorch-style bilinear interpolation matrix (out_size, in_size), float32."""
    W = np.zeros((out_size, in_size), dtype=np.float32)
    for i in range(out_size):
        if align_corners:
            src = i * (in_size - 1) / (out_size - 1) if out_size > 1 else 0.0
        else:
            src = (i + 0.5) * in_size / out_size - 0.5
            src = max(src, 0.0)  # TODO(synk): clamp verified for upsampling ratios only
        i0 = min(int(np.floor(src)), in_size - 1)
        i1 = min(i0 + 1, in_size - 1)
        w1 = src - i0
        W[i, i0] += 1.0 - w1
        W[i, i1] += w1
    return W


def _lane_flatten(x):
    """Reshape to a lane-dense (rows, 128) layout for elementwise kernel operands."""
    n = int(np.prod(x.shape))
    if n % 128 == 0:
        return x.reshape(n // 128, 128)
    return x.reshape(1, n)


def _pick_tile(m, cap=32 * 1024):
    """Largest multiple of 128 that divides m and is <= cap (fallback: m itself)."""
    if m % 128 != 0:
        return m
    t = min(cap, m)
    t = (t // 128) * 128
    while m % t != 0:
        t -= 128
    return max(t, 128)


# ----------------------------------------------------------------------------------
# Pallas kernels
# ----------------------------------------------------------------------------------

def _make_fused_prompt_kernel(bc, with_auto):
    """Fused: 3 align_corners=True upsamples + sum + final align_corners=False interp,
    plus (optionally) sigmoid(prompt) and aux_mask = sigmoid(0.7*x_unet + 0.3*cnn)."""
    def kernel(*refs):
        if with_auto:
            (w1h, w1wt, w2h, w2wt, w3h, w3wt, wph, wpwt,
             sp1, sp2, sp3, sp4, xun, cnn,
             prompt_ref, mask_ref, aux_ref) = refs
        else:
            (w1h, w1wt, w2h, w2wt, w3h, w3wt, wph, wpwt,
             sp1, sp2, sp3, sp4, prompt_ref) = refs
        f32 = jnp.float32
        W1h, W1wt = w1h[...], w1wt[...]
        W2h, W2wt = w2h[...], w2wt[...]
        W3h, W3wt = w3h[...], w3wt[...]
        Wph, Wpwt = wph[...], wpwt[...]

        def up(x2d, wh, wwt):
            # width interp then height interp; width matrix is pre-transposed on host
            t = jnp.dot(x2d.astype(f32), wwt, preferred_element_type=f32)
            return jnp.dot(wh, t, preferred_element_type=f32)

        # TODO(synk): static per-slab loop (B*C == 1 in this model); for large B*C this
        # should become a batched / gridded formulation to fill the MXU.
        for b in range(bc):
            summed = (up(sp1[b], W1h, W1wt) + up(sp2[b], W2h, W2wt)
                      + up(sp3[b], W3h, W3wt) + sp4[b].astype(f32))
            prompt = up(summed, Wph, Wpwt)
            prompt_ref[b] = prompt.astype(prompt_ref.dtype)
            if with_auto:
                mask_ref[b] = jax.nn.sigmoid(prompt).astype(mask_ref.dtype)
        if with_auto:
            aux_ref[...] = jax.nn.sigmoid(
                0.7 * xun[...] + 0.3 * cnn[...]).astype(aux_ref.dtype)
    return kernel


def _make_upsample_kernel(bc):
    """Generic bilinear upsample: o[b] = Wh @ x[b] @ WwT (WwT pre-transposed on host)."""
    def kernel(wh_ref, wwt_ref, x_ref, o_ref):
        f32 = jnp.float32
        wh = wh_ref[...]
        wwt = wwt_ref[...]
        for b in range(bc):
            t = jnp.dot(x_ref[b].astype(f32), wwt, preferred_element_type=f32)
            o_ref[b] = jnp.dot(wh, t, preferred_element_type=f32).astype(o_ref.dtype)
    return kernel


def _mc_var_kernel(logits_ref, var_ref):
    """sigmoid -> unbiased variance over samples (torch.var default) for one tile."""
    p = jax.nn.sigmoid(logits_ref[...].astype(jnp.float32))       # (N, TM)
    n = p.shape[0]
    mean = jnp.mean(p, axis=0, keepdims=True)
    var_ref[...] = jnp.sum((p - mean) ** 2, axis=0, keepdims=True) / (n - 1)


def _mc_norm_kernel(minmax_ref, var_ref, o_ref):
    """(v - min)/(max - min) + clamp[0,1]; min/max scalars read from SMEM."""
    vmin = minmax_ref[0]
    vmax = minmax_ref[1]
    # eps guards NaN/Inf when the variance map is constant (identical samples)
    u = (var_ref[...] - vmin) / (vmax - vmin + 1e-10)
    o_ref[...] = jnp.clip(u, 0.0, 1.0)


# ----------------------------------------------------------------------------------
# Pallas wrappers
# ----------------------------------------------------------------------------------

def fused_prompt(spgen1, spgen2, spgen3, spgen4, orig_size,
                 x_unet_mask=None, cnn_out=None):
    """Returns prompt (B,C,O,O), and when auto inputs are given also
    (sigmoid(prompt), aux_mask) — all from a single pallas_call."""
    B, C, S, _ = spgen4.shape
    BC = B * C
    O = orig_size
    with_auto = x_unet_mask is not None
    s1, s2, s3 = spgen1.shape[-1], spgen2.shape[-1], spgen3.shape[-1]

    w1 = _interp_matrix_np(S, s1, True)
    w2 = _interp_matrix_np(S, s2, True)
    w3 = _interp_matrix_np(S, s3, True)
    wp = _interp_matrix_np(O, S, False)

    inputs = [jnp.asarray(w1), jnp.asarray(np.ascontiguousarray(w1.T)),
              jnp.asarray(w2), jnp.asarray(np.ascontiguousarray(w2.T)),
              jnp.asarray(w3), jnp.asarray(np.ascontiguousarray(w3.T)),
              jnp.asarray(wp), jnp.asarray(np.ascontiguousarray(wp.T)),
              spgen1.reshape(BC, s1, s1), spgen2.reshape(BC, s2, s2),
              spgen3.reshape(BC, s3, s3), spgen4.reshape(BC, S, S)]
    out_shapes = [jax.ShapeDtypeStruct((BC, O, O), spgen4.dtype)]
    if with_auto:
        xun_f = _lane_flatten(x_unet_mask)
        cnn_f = _lane_flatten(cnn_out.astype(x_unet_mask.dtype))
        inputs += [xun_f, cnn_f]
        out_shapes += [jax.ShapeDtypeStruct((BC, O, O), spgen4.dtype),
                       jax.ShapeDtypeStruct(xun_f.shape, x_unet_mask.dtype)]

    # advisory cost estimate for XLA scheduling
    def mm(m, k, n):
        return 2 * m * k * n
    flops = BC * (mm(s1, s1, S) + mm(S, s1, S) + mm(s2, s2, S) + mm(S, s2, S)
                  + mm(s3, s3, S) + mm(S, s3, S) + mm(S, S, O) + mm(O, S, O))
    trans = (BC * O * O + BC * S * S) if with_auto else 0
    nbytes = sum(int(np.prod(a.shape)) * 4 for a in inputs)
    nbytes += sum(int(np.prod(o.shape)) * 4 for o in out_shapes)

    outs = pl.pallas_call(
        _make_fused_prompt_kernel(BC, with_auto),
        out_shape=tuple(out_shapes),
        cost_estimate=pl.CostEstimate(flops=int(flops), transcendentals=int(trans),
                                      bytes_accessed=int(nbytes)),
    )(*inputs)

    prompt = outs[0].reshape(B, C, O, O)
    if with_auto:
        mask_sig = outs[1].reshape(B, C, O, O)
        aux_mask = outs[2].reshape(x_unet_mask.shape)
        return prompt, mask_sig, aux_mask
    return prompt


def bilinear_upsample(x, out_h, out_w, align_corners):
    """x: (B, C, H, W) -> (B, C, out_h, out_w); one VMEM-resident pallas_call."""
    B, C, H, W = x.shape
    BC = B * C
    wh = jnp.asarray(_interp_matrix_np(out_h, H, align_corners))
    wwt = jnp.asarray(np.ascontiguousarray(_interp_matrix_np(out_w, W, align_corners).T))
    out = pl.pallas_call(
        _make_upsample_kernel(BC),
        out_shape=jax.ShapeDtypeStruct((BC, out_h, out_w), x.dtype),
    )(wh, wwt, x.reshape(BC, H, W))
    return out.reshape(B, C, out_h, out_w)


def mc_uncertainty(logit_samples):
    """logit_samples: (N, B, C, H, W) -> normalized uncertainty (B, C, H, W)."""
    N = logit_samples.shape[0]
    out_sh = logit_samples.shape[1:]
    M = int(np.prod(out_sh))
    flat = logit_samples.reshape(N, M).astype(jnp.float32)

    TM = _pick_tile(M)            # lane-aligned tile so the kernel scales past VMEM
    grid = (M // TM,)

    var = pl.pallas_call(
        _mc_var_kernel,
        out_shape=jax.ShapeDtypeStruct((1, M), jnp.float32),
        grid=grid,
        in_specs=[pl.BlockSpec((N, TM), lambda i: (0, i))],
        out_specs=pl.BlockSpec((1, TM), lambda i: (0, i)),
        compiler_params=pltpu.CompilerParams(dimension_semantics=("parallel",)),
    )(flat)

    minmax = jnp.stack([jnp.min(var), jnp.max(var)])    # tiny global reduce

    u = pl.pallas_call(
        _mc_norm_kernel,
        out_shape=jax.ShapeDtypeStruct((1, M), jnp.float32),
        grid=grid,
        in_specs=[pl.BlockSpec(memory_space=pltpu.MemorySpace.SMEM),
                  pl.BlockSpec((1, TM), lambda i: (0, i))],
        out_specs=pl.BlockSpec((1, TM), lambda i: (0, i)),
        compiler_params=pltpu.CompilerParams(dimension_semantics=("parallel",)),
    )(minmax, var)
    return u.reshape(out_sh).astype(logit_samples.dtype)


# ----------------------------------------------------------------------------------
# Deterministic stubs for external sub-modules (sam / unet / unet_uncertainty)
# ----------------------------------------------------------------------------------

def _avg_pool(x, f):
    B, C, H, W = x.shape
    return x.reshape(B, C, H // f, f, W // f, f).mean(axis=(3, 5))


def make_params(key, S, emb_c=8):
    ks = jax.random.split(key, 8)
    return {
        "unet_scale": 1.3,
        "unet_bias": -0.1,
        "unc_noise_key": ks[0],
        "s": jax.random.normal(ks[1], (4,), jnp.float32) * 0.5 + 1.0,
        "b": jax.random.normal(ks[2], (4,), jnp.float32) * 0.1,
        "emb_scale": jax.random.normal(ks[3], (emb_c,), jnp.float32),
        "main_unc_map": jax.random.normal(ks[4], (1, 1, S, S), jnp.float32),
        "dense_emb": jax.random.normal(ks[5], (1, emb_c, 8, 8), jnp.float32) * 0.1,
        "pe": jax.random.normal(ks[6], (1, emb_c, 8, 8), jnp.float32) * 0.1,
        "dec_w": jax.random.normal(ks[7], (emb_c,), jnp.float32),
    }


def unet_stub(x, p):
    # TODO(synk): stand-in for the external UNet (weights are synthetic).
    return x * p["unet_scale"] + p["unet_bias"]


def unet_uncertainty_stub(x, p, sample_idx):
    # Deterministic "MC dropout" perturbation per sample.
    noise = jax.random.normal(jax.random.fold_in(p["unc_noise_key"], sample_idx),
                              x.shape, jnp.float32)
    return unet_stub(x, p) + 0.2 * noise


def sam_image_encoder_stub(x, origin, p):
    xg = jnp.mean(x, axis=1, keepdims=True)                         # (1,1,S,S)
    sp1 = _avg_pool(xg, 8) * p["s"][0] + p["b"][0]                  # (1,1,S/8,S/8)
    sp2 = _avg_pool(xg, 4) * p["s"][1] + p["b"][1]
    sp3 = _avg_pool(xg, 2) * p["s"][2] + p["b"][2]
    sp4 = xg * p["s"][3] + p["b"][3]
    cnn_out = 0.6 * xg + 0.4 * origin
    emb8 = _avg_pool(xg, xg.shape[-1] // 8)                         # (1,1,8,8)
    img_embedding = emb8 * p["emb_scale"].reshape(1, -1, 1, 1)      # (1,8,8,8)
    main_uncertainty_map = jax.nn.sigmoid(p["main_unc_map"])        # in [0,1]
    return img_embedding, sp1, sp2, sp3, sp4, cnn_out, main_uncertainty_map


def prompt_encoder_stub(p):
    sparse = jnp.zeros((1, 0, p["dense_emb"].shape[1]), jnp.float32)
    return sparse, p["dense_emb"]


def mask_decoder_stub(img_embedding, image_pe, dense_emb, p):
    fused = img_embedding + dense_emb + image_pe                    # (1,E,8,8)
    low8 = jnp.sum(fused * p["dec_w"].reshape(1, -1, 1, 1), axis=1, keepdims=True)
    low_res = bilinear_upsample(low8, 16, 16, align_corners=False)  # (1,1,16,16)
    iou = jnp.mean(low_res).reshape(1, 1)
    return low_res, iou


# ----------------------------------------------------------------------------------
# Model.forward equivalent
# ----------------------------------------------------------------------------------

def predict_with_uncertainty_jax(x_unet, p, n_samples=10):
    mask = unet_stub(x_unet, p)                                     # raw logits (no drop)
    logit_samples = jnp.stack(
        [unet_uncertainty_stub(x_unet, p, i) for i in range(n_samples)], axis=0)
    uncertainty = mc_uncertainty(logit_samples)                     # Pallas kernels
    return mask, uncertainty


def model_forward(x, x_unet, origin, is_auto_prompt, params, orig_size=64):
    # UNet + MC-dropout uncertainty
    x_unet_mask, uncertainty_map = predict_with_uncertainty_jax(x_unet, params, 10)

    # SAM image encoder (stub)
    (img_embedding, spgen1, spgen2, spgen3, spgen4,
     cnn_out, main_uncertainty_map) = sam_image_encoder_stub(x, origin, params)

    final_edge_map = None
    segments = None
    points = []

    if is_auto_prompt:
        # One fused Pallas kernel: up1+up2+up3, sum, postprocess interp, sigmoid(prompt),
        # and aux_mask = sigmoid(0.7*x_unet + 0.3*cnn_out)
        prompt, mask_sig, aux_mask = fused_prompt(
            spgen1, spgen2, spgen3, spgen4, orig_size,
            x_unet_mask=x_unet_mask, cnn_out=cnn_out)
        # TODO(synk): generate_edge_map (skimage sobel/gaussian/laplace), SLIC superpixels,
        #             select_points_grid / select_points_mask_superpixels and NMS are
        #             host-side data-dependent logic with no Pallas equivalent.
        del mask_sig, aux_mask
    else:
        prompt = fused_prompt(spgen1, spgen2, spgen3, spgen4, orig_size)

    autoMask = prompt

    # No points selected -> prompt_encoder(points=None) path
    sparse_embeddings, dense_embeddings = prompt_encoder_stub(params)
    low_res_masks, iou_predictions = mask_decoder_stub(
        img_embedding, params["pe"], dense_embeddings, params)
    masks = bilinear_upsample(low_res_masks, orig_size, orig_size, align_corners=False)

    return (masks, autoMask, points, uncertainty_map, x_unet_mask,
            segments, cnn_out, final_edge_map, main_uncertainty_map)


# ----------------------------------------------------------------------------------

if __name__ == "__main__":
    S = 32        # base spatial size (stand-in for 256/1024 in the real pipeline)
    ORIG = 64     # stand-in for the 512x512 "original_size" in postprocess_masks

    key = jax.random.PRNGKey(0)
    kx, ku, ko = jax.random.split(key, 3)
    x = jax.random.normal(kx, (1, 3, S, S), jnp.float32)        # SAM image input
    x_unet = jax.random.normal(ku, (1, 1, S, S), jnp.float32)   # UNet input
    origin = jax.random.normal(ko, (1, 1, S, S), jnp.float32)   # original image

    params = make_params(jax.random.PRNGKey(42), S)

    outs = model_forward(x, x_unet, origin, True, params, orig_size=ORIG)

    for o in outs:
        if isinstance(o, jnp.ndarray):
            jax.block_until_ready(o)

    masks, autoMask = outs[0], outs[1]
    assert masks.shape == (1, 1, ORIG, ORIG)
    assert autoMask.shape == (1, 1, ORIG, ORIG)
    assert outs[3].shape == (1, 1, S, S)   # uncertainty_map
    assert bool(jnp.all(jnp.isfinite(masks)))
    assert bool(jnp.all(jnp.isfinite(autoMask)))
    assert bool(jnp.all((outs[3] >= 0.0) & (outs[3] <= 1.0)))

    print("KERNEL_OK")
</pallas_src>

<mosaic_0001>
module attributes {stable_mosaic.version = 11 : i64} {
  func.func @_mc_var_kernel(%arg0: i32, %arg1: memref<10x1024xf32, #tpu.memory_space<vmem>>, %arg2: memref<1x1024xf32, #tpu.memory_space<vmem>>) attributes {dimension_semantics = [#tpu.dimension_semantics<parallel>], iteration_bounds = array<i64: 1>, scalar_prefetch = 0 : i64, scratch_operands = 0 : i64, tpu.core_type = #tpu.core_type<tc>, window_params = [{transform_indices = @transform_0, window_bounds = array<i64: 10, 1024>}, {transform_indices = @transform_1, window_bounds = array<i64: 1, 1024>}]} {
    %c0 = arith.constant 0 : index
    %c0_0 = arith.constant 0 : index
    %0 = vector.load %arg1[%c0, %c0_0] : memref<10x1024xf32, #tpu.memory_space<vmem>>, vector<10x1024xf32>
    %1 = arith.negf %0 : vector<10x1024xf32>
    %2 = math.exp %1 : vector<10x1024xf32>
    %cst = arith.constant 1.000000e+00 : f32
    %3 = vector.broadcast %cst : f32 to vector<10x1024xf32>
    %4 = arith.addf %3, %2 : vector<10x1024xf32>
    %5 = arith.divf %3, %4 : vector<10x1024xf32>
    %cst_1 = arith.constant dense<0.000000e+00> : vector<1024xf32>
    %6 = vector.multi_reduction <add>, %5, %cst_1 [0] : vector<10x1024xf32> to vector<1024xf32>
    %7 = vector.shape_cast %6 : vector<1024xf32> to vector<1x1024xf32>
    %cst_2 = arith.constant 1.000000e+01 : f32
    %8 = vector.broadcast %cst_2 : f32 to vector<1x1024xf32>
    %9 = arith.divf %7, %8 : vector<1x1024xf32>
    %10 = vector.broadcast %9 : vector<1x1024xf32> to vector<10x1024xf32>
    %11 = arith.subf %5, %10 : vector<10x1024xf32>
    %12 = arith.mulf %11, %11 : vector<10x1024xf32>
    %cst_3 = arith.constant dense<0.000000e+00> : vector<1024xf32>
    %13 = vector.multi_reduction <add>, %12, %cst_3 [0] : vector<10x1024xf32> to vector<1024xf32>
    %14 = vector.shape_cast %13 : vector<1024xf32> to vector<1x1024xf32>
    %cst_4 = arith.constant 9.000000e+00 : f32
    %15 = vector.broadcast %cst_4 : f32 to vector<1x1024xf32>
    %16 = arith.divf %14, %15 : vector<1x1024xf32>
    %c0_5 = arith.constant 0 : index
    %c0_6 = arith.constant 0 : index
    %17 = vector.load %arg2[%c0_5, %c0_6] : memref<1x1024xf32, #tpu.memory_space<vmem>>, vector<1x1024xf32>
    tpu.vector_store %arg2[%c0_5, %c0_6], %16 {strides = array<i32>} : memref<1x1024xf32, #tpu.memory_space<vmem>>, vector<1x1024xf32>,
    return
  }
  func.func @transform_0(%arg0: i32) -> (i32, i32) {
    %c0_i32 = arith.constant 0 : i32
    %c0_i32_0 = arith.constant 0 : i32
    return %c0_i32, %arg0 : i32, i32
  }
  func.func @transform_1(%arg0: i32) -> (i32, i32) {
    %c0_i32 = arith.constant 0 : i32
    %c0_i32_0 = arith.constant 0 : i32
    return %c0_i32, %arg0 : i32, i32
  }
}

</mosaic_0001>

<bundles_post_ra>
// kernel: tpu_custom_call.1
= control target key start
LH: loop header
LB: loop body
LE: loop exit
PB: predicated region body
PF: predicated region fallthrough
CT: control target
= control target key end

     0   :  { %6 = vsyncpa [#allocation3], 0  ;;  %s626_s0 = inlined_call_operand.hbm [shape: f32[10,1024], index: 0, kind: input, shape index: {}]   ;;  %s627_s1 = inlined_call_operand.hbm [shape: f32[1,1024], index: 1, kind: output, shape index: {}]  }
   0x1   :  { %7 = vsyncpa [#allocation4], 0  ;;  %s517_s6 = smov [#allocation2]  }
   0x2   :  { %s13_s7 = sshll.u32 %s517_s6, 4  ;;  %s14_s7 = int_to_ptr.vmem [resolvable:$true] %s13_s7 }
   0x3   :  { %s481_s8 = scalar_lea.vmem %s14_s7, 2048  ;;  %p486_p1 = scmp.lt.s32.totalorder %s14_s7, %s14_s7 }
   0x4   :  { %p482_p0 = scmp.ne.s32.totalorder %s14_s7, %s481_s8  ;;  %p487_p2 = scmp.lt.s32.totalorder %s481_s8, %s481_s8 }
   0x6   :  { %p488_p3 = por %p487_p2, %p486_p1 }
   0x8   :  { %p489_p4 = pnand %p488_p3, %p482_p0 }
   0xa   :  { %492 = shalt.err (!%p489_p4)
}
   0xb   :  { %s518_s9 = smov 1024   ;;  %s519_s10 = smov 64  }
   0xc   :  { %19 = dma.hbm_to_vmem [thread:$0]  %s626_s0, 2048, %s14_s7, [#allocation3], %s518_s9, %s518_s9, %s519_s10  }
   0xd   :  { %513 = dma.done.wait [#allocation3], 2048  }
   0xe   :  { %514 = vsyncadd [#allocation3], 4294965248  ;;  %v23_v0 = vld [vmem:[#allocation2] sm:$0xff]  ;;  %v24_v1 = vld [vmem:[#allocation2 + $0x8] sm:$0xff]  ;;  %vm135_vm0 = vcmask 1041408   ;;  %s521_s0 = smov [#allocation5]  }
   0xf   :  { %v388_v2 = vmul.f32 -1.442695, %v23_v0  ;;  %v25_v3 = vld [vmem:[#allocation2 + $0x10] sm:$0xff]  ;;  %v26_v4 = vld [vmem:[#allocation2 + $0x18] sm:$0xff]  ;;  %v389_v5 = vmul.f32 -1.442695, %v24_v1 }
  0x10   :  { %v27_v6 = vld [vmem:[#allocation2 + $0x20] sm:$0xff]  ;;  %v28_v7 = vld [vmem:[#allocation2 + $0x28] sm:$0xff]  ;;  %v29_v8 = vld [vmem:[#allocation2 + $0x30] sm:$0xff]  ;;  %v390_v10 = vmul.f32 -1.442695, %v25_v3  ;;  %s379_s13 = sshll.u32 %s521_s0, 4  ;;  %s380_s13 = int_to_ptr.vmem [resolvable:$true] %s379_s13 }
  0x11   :  { %409 = vpow2.f32 %v388_v2  ;;  %v30_v9 = vld [vmem:[#allocation2 + $0x38] sm:$0xff]  ;;  %v391_v11 = vmul.f32 -1.442695, %v26_v4  ;;  %v31_v12 = vld [vmem:[#allocation2 + $0x40] sm:$0x3]  ;;  %s493_s14 = scalar_lea.vmem %s380_s13, 128  ;;  %p498_p6 = scmp.lt.s32.totalorder %s380_s13, %s380_s13 }
  0x12   :  { %411 = vpow2.f32 %v389_v5  ;;  %v392_v13 = vmul.f32 -1.442695, %v27_v6  ;;  %v393_v14 = vmul.f32 -1.442695, %v28_v7  ;;  %v32_v15 = vld [vmem:[#allocation2 + $0x48] sm:$0x3]  ;;  %v329_v7 = vlaneseq  ;;  %p494_p5 = scmp.ne.s32.totalorder %s380_s13, %s493_s14  ;;  %p499_p7 = scmp.lt.s32.totalorder %s493_s14, %s493_s14 }
  0x13   :  { %413 = vpow2.f32 %v390_v10  ;;  %v394_v16 = vmul.f32 -1.442695, %v29_v8  ;;  %v33_v17 = vld [vmem:[#allocation2 + $0x50] sm:$0x3]  ;;  %v395_v18 = vmul.f32 -1.442695, %v30_v9 }
  0x14   :  { %415 = vpow2.f32 %v391_v11  ;;  %v34_v19 = vld [vmem:[#allocation2 + $0x58] sm:$0x3]  ;;  %v396_v20 = vmul.f32 -1.442695, %v31_v12  ;;  %v35_v21 = vld [vmem:[#allocation2 + $0x60] sm:$0x3]  ;;  %p500_p8 = por %p499_p7, %p498_p6 }
  0x15   :  { %417 = vpow2.f32 %v392_v13  ;;  %v397_v22 = vmul.f32 -1.442695, %v32_v15  ;;  %v36_v23 = vld [vmem:[#allocation2 + $0x68] sm:$0x3]  ;;  %v398_v24 = vmul.f32 -1.442695, %v33_v17 }
  0x16   :  { %419 = vpow2.f32 %v393_v14  ;;  %v37_v25 = vld [vmem:[#allocation2 + $0x70] sm:$0x3]  ;;  %v399_v26 = vmul.f32 -1.442695, %v34_v19  ;;  %v38_v27 = vld [vmem:[#allocation2 + $0x78] sm:$0x3]  ;;  %p501_p9 = pnand %p500_p8, %p494_p5 }
  0x17   :  { %421 = vpow2.f32 %v394_v16  ;;  %v400_v28 = vmul.f32 -1.442695, %v35_v21  ;;  %v401_v29 = vmul.f32 -1.442695, %v36_v23  ;;  %v402_v30 = vmul.f32 -1.442695, %v37_v25 }
  0x18   :  { %423 = vpow2.f32 %v395_v18  ;;  %v403_v32 = vmul.f32 -1.442695, %v38_v27  ;;  %v520_v5 = vmov 1966171168   ;;  %v330_v14 = vshrl.u32 %v329_v7, 7 }
  0x19   :  { %425 = vpow2.f32 %v396_v20  ;;  %v327_v6 = vunpack.c.l.s4 %v520_v5 }
  0x1a   :  { %427 = vpow2.f32 %v397_v22 }
  0x1b   :  { %429 = vpow2.f32 %v398_v24  ;;  %v328_v13 = vunpack.c.0.s8 %v327_v6 }
  0x1c   :  { %431 = vpow2.f32 %v399_v26 }
  0x1d   :  { %433 = vpow2.f32 %v400_v28 }
  0x1e   :  { %v410_v31 = vpop.eup %409  ;;  %435 = vpow2.f32 %v401_v29  ;;  %v575_v29 = vsub.s32 %v328_v13, %v330_v14 }
  0x1f   :  { %v412_v33 = vpop.eup %411  ;;  %v87_v34 = vadd.f32 1.0, %v410_v31  ;;  %437 = vpow2.f32 %v402_v30 }
  0x20   :  { %v88_v35 = vadd.f32 1.0, %v412_v33  ;;  %v414_v36 = vpop.eup %413  ;;  %439 = vpow2.f32 %v403_v32 }
  0x21   :  { %v416_v37 = vpop.eup %415  ;;  %v89_v38 = vadd.f32 1.0, %v414_v36  ;;  %441 = vrcp.f32 %v87_v34 }
  0x22   :  { %v418_v39 = vpop.eup %417  ;;  %v90_v40 = vadd.f32 1.0, %v416_v37  ;;  %443 = vrcp.f32 %v88_v35 }
  0x23   :  { %v420_v41 = vpop.eup %419  ;;  %v91_v42 = vadd.f32 1.0, %v418_v39  ;;  %445 = vrcp.f32 %v89_v38 }
  0x24   :  { %v422_v43 = vpop.eup %421  ;;  %v92_v44 = vadd.f32 1.0, %v420_v41  ;;  %447 = vrcp.f32 %v90_v40 }
  0x25   :  { %v424_v45 = vpop.eup %423  ;;  %v93_v46 = vadd.f32 1.0, %v422_v43  ;;  %449 = vrcp.f32 %v91_v42 }
  0x26   :  { %v426_v47 = vpop.eup %425  ;;  %451 = vrcp.f32 %v92_v44  ;;  %v94_v61 = vadd.f32 1.0, %v424_v45 }
  0x27   :  { %v428_v48 = vpop.eup %427  ;;  %v95_v49 = vadd.f32 1.0, %v426_v47  ;;  %453 = vrcp.f32 %v93_v46 }
  0x28   :  { %v430_v50 = vpop.eup %429  ;;  %v96_v51 = vadd.f32 1.0, %v428_v48 }
  0x29   :  { %v432_v52 = vpop.eup %431  ;;  %v97_v53 = vadd.f32 1.0, %v430_v50  ;;  %455 = vrcp.f32 %v95_v49 }
  0x2a   :  { %v434_v54 = vpop.eup %433  ;;  %v98_v55 = vadd.f32 1.0, %v432_v52  ;;  %457 = vrcp.f32 %v96_v51 }
  0x2b   :  { %v436_v56 = vpop.eup %435  ;;  %v99_v57 = vadd.f32 1.0, %v434_v54  ;;  %459 = vrcp.f32 %v97_v53 }
  0x2c   :  { %v438_v58 = vpop.eup %437  ;;  %v100_v59 = vadd.f32 1.0, %v436_v56  ;;  %461 = vrcp.f32 %v98_v55 }
  0x2d   :  { %v440_v60 = vpop.eup %439  ;;  %v101_v62 = vadd.f32 1.0, %v438_v58  ;;  %463 = vrcp.f32 %v99_v57 }
  0x2e   :  { %v102_v63 = vadd.f32 1.0, %v440_v60  ;;  %465 = vrcp.f32 %v100_v59  ;;  %v535_v0 = vpop.eup %441 }
  0x2f   :  { %467 = vrcp.f32 %v101_v62  ;;  %v537_v1 = vpop.eup %443 }
  0x30   :  { %469 = vrcp.f32 %v102_v63  ;;  %v539_v2 = vpop.eup %445 }
  0x31   :  { %471 = vrcp.f32 %v94_v61  ;;  %v541_v3 = vpop.eup %447 }
  0x32   :  { %v543_v4 = vpop.eup %449 }
  0x33   :  { %v545_v8 = vpop.eup %451 }
  0x34   :  { %v547_v9 = vpop.eup %453 }
  0x36   :  { %v549_v10 = vpop.eup %455 }
  0x37   :  { %v551_v11 = vpop.eup %457  ;;  %v136_v12 = vsel %vm135_vm0, %v549_v10, 0.0 }
  0x38   :  { %v555_v15 = vpop.eup %459  ;;  %v137_v16 = vadd.f32 %v535_v0, %v136_v12  ;;  %v144_v17 = vsel %vm135_vm0, %v551_v11, 0.0 }
  0x39   :  { %v560_v18 = vpop.eup %461  ;;  %v145_v19 = vadd.f32 %v537_v1, %v144_v17  ;;  %v152_v20 = vsel %vm135_vm0, %v555_v15, 0.0 }
  0x3a   :  { %v565_v21 = vpop.eup %463  ;;  %v138_v22 = vrot.slane %v137_v16, 4  ;;  %v153_v23 = vadd.f32 %v539_v2, %v152_v20  ;;  %v160_v24 = vsel %vm135_vm0, %v560_v18, 0.0 }
  0x3b   :  { %v570_v25 = vpop.eup %465  ;;  %v146_v26 = vrot.slane %v145_v19, 4  ;;  %v161_v27 = vadd.f32 %v541_v3, %v160_v24  ;;  %v168_v28 = vsel %vm135_vm0, %v565_v21, 0.0 }
  0x3c   :  { %v577_v30 = vpop.eup %467  ;;  %v139_v31 = vadd.f32 %v138_v22, %v137_v16  ;;  %v154_v32 = vrot.slane %v153_v23, 4  ;;  %v169_v33 = vadd.f32 %v543_v4, %v168_v28  ;;  %v176_v34 = vsel %vm135_vm0, %v570_v25, 0.0 }
  0x3d   :  { %v582_v35 = vpop.eup %469  ;;  %v147_v36 = vadd.f32 %v146_v26, %v145_v19  ;;  %v162_v37 = vrot.slane %v161_v27, 4  ;;  %v177_v38 = vadd.f32 %v545_v8, %v176_v34  ;;  %v184_v39 = vsel %vm135_vm0, %v577_v30, 0.0 }
  0x3e   :  { %v587_v40 = vpop.eup %471  ;;  %v140_v41 = vrot.slane %v139_v31, 2  ;;  %v155_v42 = vadd.f32 %v154_v32, %v153_v23  ;;  %v170_v43 = vrot.slane %v169_v33, 4  ;;  %v185_v44 = vadd.f32 %v547_v9, %v184_v39 }
  0x3f   :  { %v148_v45 = vrot.slane %v147_v36, 2  ;;  %v163_v46 = vadd.f32 %v162_v37, %v161_v27  ;;  %v178_v47 = vrot.slane %v177_v38, 4  ;;  %v192_v48 = vsel %vm135_vm0, %v582_v35, 0.0 }
  0x40   :  { %v141_v49 = vadd.f32 %v140_v41, %v139_v31  ;;  %v156_v50 = vrot.slane %v155_v42, 2  ;;  %v171_v51 = vadd.f32 %v170_v43, %v169_v33  ;;  %v186_v52 = vrot.slane %v185_v44, 4 }
  0x41   :  { %v149_v53 = vadd.f32 %v148_v45, %v147_v36  ;;  %v164_v54 = vrot.slane %v163_v46, 2  ;;  %v179_v55 = vadd.f32 %v178_v47, %v177_v38  ;;  %v193_v56 = vadd.f32 %v587_v40, %v192_v48 }
  0x42   :  { %v142_v57 = vrot.slane %v141_v49, 1  ;;  %v157_v58 = vadd.f32 %v156_v50, %v155_v42  ;;  %v172_v59 = vrot.slane %v171_v51, 2  ;;  %v187_v60 = vadd.f32 %v186_v52, %v185_v44 }
  0x43   :  { %v150_v61 = vrot.slane %v149_v53, 1  ;;  %v165_v62 = vadd.f32 %v164_v54, %v163_v46  ;;  %v180_v63 = vrot.slane %v179_v55, 2  ;;  %v194_v5 = vrot.slane %v193_v56, 4 }
  0x44   :  { %v143_v6 = vadd.f32 %v142_v57, %v141_v49  ;;  %v158_v7 = vrot.slane %v157_v58, 1  ;;  %v173_v12 = vadd.f32 %v172_v59, %v171_v51  ;;  %v188_v13 = vrot.slane %v187_v60, 2 }
  0x45   :  { %v151_v14 = vadd.f32 %v150_v61, %v149_v53  ;;  %v166_v16 = vrot.slane %v165_v62, 1  ;;  %v181_v17 = vadd.f32 %v180_v63, %v179_v55  ;;  %v195_v19 = vadd.f32 %v194_v5, %v193_v56 }
  0x46   :  { %v159_v20 = vadd.f32 %v158_v7, %v157_v58  ;;  %v174_v22 = vrot.slane %v173_v12, 1  ;;  %v189_v23 = vadd.f32 %v188_v13, %v187_v60  ;;  %v201_v24 = vmul.f32 0.1, %v143_v6 }
  0x47   :  { %v167_v26 = vadd.f32 %v166_v16, %v165_v62  ;;  %v182_v27 = vrot.slane %v181_v17, 1  ;;  %v196_v28 = vrot.slane %v195_v19, 2  ;;  %v202_v31 = vmul.f32 0.1, %v151_v14 }
  0x48   :  { %v175_v32 = vadd.f32 %v174_v22, %v173_v12  ;;  %v190_v33 = vrot.slane %v189_v23, 1  ;;  %v203_v34 = vmul.f32 0.1, %v159_v20  ;;  %v209_v36 = vsub.f32 %v535_v0, %v201_v24 }
  0x49   :  { %v183_v37 = vadd.f32 %v182_v27, %v181_v17  ;;  %v197_v38 = vadd.f32 %v196_v28, %v195_v19  ;;  %v204_v39 = vmul.f32 0.1, %v167_v26  ;;  %v210_v41 = vsub.f32 %v537_v1, %v202_v31 }
  0x4a   :  { %v191_v42 = vadd.f32 %v190_v33, %v189_v23  ;;  %v205_v43 = vmul.f32 0.1, %v175_v32  ;;  %v211_v44 = vsub.f32 %v539_v2, %v203_v34  ;;  %v217_v45 = vsub.f32 %v549_v10, %v201_v24 }
  0x4b   :  { %v198_v46 = vrot.slane %v197_v38, 1  ;;  %v206_v47 = vmul.f32 0.1, %v183_v37  ;;  %v212_v48 = vsub.f32 %v541_v3, %v204_v39  ;;  %v218_v49 = vsub.f32 %v551_v11, %v202_v31 }
  0x4c   :  { %v207_v50 = vmul.f32 0.1, %v191_v42  ;;  %v213_v0 = vsub.f32 %v543_v4, %v205_v43  ;;  %v219_v51 = vsub.f32 %v555_v15, %v203_v34  ;;  %v220_v52 = vsub.f32 %v560_v18, %v204_v39 }
  0x4d   :  { %v199_v1 = vadd.f32 %v198_v46, %v197_v38  ;;  %v214_v53 = vsub.f32 %v545_v8, %v206_v47  ;;  %v221_v2 = vsub.f32 %v565_v21, %v205_v43  ;;  %v222_v10 = vsub.f32 %v570_v25, %v206_v47 }
  0x4e   :  { %v215_v54 = vsub.f32 %v547_v9, %v207_v50  ;;  %v223_v3 = vsub.f32 %v577_v30, %v207_v50  ;;  %v225_v55 = vmul.f32 %v209_v36, %v209_v36  ;;  %v226_v11 = vmul.f32 %v210_v41, %v210_v41 }
  0x4f   :  { %v208_v56 = vmul.f32 0.1, %v199_v1  ;;  %v227_v57 = vmul.f32 %v211_v44, %v211_v44  ;;  %v228_v4 = vmul.f32 %v212_v48, %v212_v48  ;;  %v229_v58 = vmul.f32 %v213_v0, %v213_v0 }
  0x50   :  { %v230_v15 = vmul.f32 %v214_v53, %v214_v53  ;;  %v231_v59 = vmul.f32 %v215_v54, %v215_v54  ;;  %v233_v18 = vmul.f32 %v217_v45, %v217_v45  ;;  %v234_v60 = vmul.f32 %v218_v49, %v218_v49 }
  0x51   :  { %v216_v8 = vsub.f32 %v587_v40, %v208_v56  ;;  %v224_v21 = vsub.f32 %v582_v35, %v208_v56  ;;  %v235_v61 = vmul.f32 %v219_v51, %v219_v51  ;;  %v236_v25 = vmul.f32 %v220_v52, %v220_v52 }
  0x52   :  { %v237_v62 = vmul.f32 %v221_v2, %v221_v2  ;;  %v238_v9 = vmul.f32 %v222_v10, %v222_v10  ;;  %v239_v63 = vmul.f32 %v223_v3, %v223_v3  ;;  %v241_v30 = vsel %vm135_vm0, %v233_v18, 0.0 }
  0x53   :  { %v232_v5 = vmul.f32 %v216_v8, %v216_v8  ;;  %v240_v6 = vmul.f32 %v224_v21, %v224_v21  ;;  %v242_v7 = vadd.f32 %v241_v30, %v225_v55  ;;  %v249_v12 = vsel %vm135_vm0, %v234_v60, 0.0 }
  0x54   :  { %v250_v13 = vadd.f32 %v249_v12, %v226_v11  ;;  %v257_v14 = vsel %vm135_vm0, %v235_v61, 0.0  ;;  %v265_v16 = vsel %vm135_vm0, %v236_v25, 0.0  ;;  %v273_v40 = vsel %vm135_vm0, %v237_v62, 0.0 }
  0x55   :  { %v243_v35 = vrot.slane %v242_v7, 4  ;;  %v258_v17 = vadd.f32 %v257_v14, %v227_v57  ;;  %v266_v19 = vadd.f32 %v265_v16, %v228_v4  ;;  %v274_v20 = vadd.f32 %v273_v40, %v229_v58 }
  0x56   :  { %v251_v22 = vrot.slane %v250_v13, 4  ;;  %v281_v23 = vsel %vm135_vm0, %v238_v9, 0.0  ;;  %v289_v24 = vsel %vm135_vm0, %v239_v63, 0.0  ;;  %v297_v26 = vsel %vm135_vm0, %v240_v6, 0.0 }
  0x57   :  { %v244_v27 = vadd.f32 %v243_v35, %v242_v7  ;;  %v259_v28 = vrot.slane %v258_v17, 4  ;;  %v267_v31 = vrot.slane %v266_v19, 4  ;;  %v275_v32 = vrot.slane %v274_v20, 4 }
  0x58   :  { %v252_v33 = vadd.f32 %v251_v22, %v250_v13  ;;  %v282_v34 = vadd.f32 %v281_v23, %v230_v15  ;;  %v290_v36 = vadd.f32 %v289_v24, %v231_v59  ;;  %v298_v37 = vadd.f32 %v297_v26, %v232_v5 }
  0x59   :  { %v245_v38 = vrot.slane %v244_v27, 2  ;;  %v260_v39 = vadd.f32 %v259_v28, %v258_v17  ;;  %v268_v41 = vadd.f32 %v267_v31, %v266_v19  ;;  %v276_v42 = vadd.f32 %v275_v32, %v274_v20 }
  0x5a   :  { %v253_v43 = vrot.slane %v252_v33, 2  ;;  %v283_v44 = vrot.slane %v282_v34, 4  ;;  %v291_v45 = vrot.slane %v290_v36, 4  ;;  %v299_v46 = vrot.slane %v298_v37, 4 }
  0x5b   :  { %v246_v47 = vadd.f32 %v245_v38, %v244_v27  ;;  %v261_v48 = vrot.slane %v260_v39, 2  ;;  %v269_v49 = vrot.slane %v268_v41, 2  ;;  %v277_v50 = vrot.slane %v276_v42, 2 }
  0x5c   :  { %v254_v0 = vadd.f32 %v253_v43, %v252_v33  ;;  %v284_v51 = vadd.f32 %v283_v44, %v282_v34  ;;  %v292_v52 = vadd.f32 %v291_v45, %v290_v36  ;;  %v300_v1 = vadd.f32 %v299_v46, %v298_v37 }
  0x5d   :  { %v247_v53 = vrot.slane %v246_v47, 1  ;;  %v262_v2 = vadd.f32 %v261_v48, %v260_v39  ;;  %v270_v10 = vadd.f32 %v269_v49, %v268_v41  ;;  %v278_v54 = vadd.f32 %v277_v50, %v276_v42 }
  0x5e   :  { %v255_v3 = vrot.slane %v254_v0, 1  ;;  %v285_v55 = vrot.slane %v284_v51, 2  ;;  %v293_v11 = vrot.slane %v292_v52, 2  ;;  %v301_v56 = vrot.slane %v300_v1, 2 }
  0x5f   :  { %v248_v57 = vadd.f32 %v247_v53, %v246_v47  ;;  %v263_v4 = vrot.slane %v262_v2, 1  ;;  %v271_v58 = vrot.slane %v270_v10, 1  ;;  %v279_v15 = vrot.slane %v278_v54, 1 }
  0x60   :  { %v256_v59 = vadd.f32 %v255_v3, %v254_v0  ;;  %v286_v18 = vadd.f32 %v285_v55, %v284_v51  ;;  %v294_v60 = vadd.f32 %v293_v11, %v292_v52  ;;  %v302_v8 = vadd.f32 %v301_v56, %v300_v1 }
  0x61   :  { %v264_v21 = vadd.f32 %v263_v4, %v262_v2  ;;  %v272_v61 = vadd.f32 %v271_v58, %v270_v10  ;;  %v280_v25 = vadd.f32 %v279_v15, %v278_v54  ;;  %v306_v62 = vmul.f32 0.11111111, %v248_v57 }
  0x62   :  { %v287_v9 = vrot.slane %v286_v18, 1  ;;  %v295_v63 = vrot.slane %v294_v60, 1  ;;  %v303_v30 = vrot.slane %v302_v8, 1  ;;  %v307_v5 = vmul.f32 0.11111111, %v256_v59 }
  0x63   :  { %v308_v6 = vmul.f32 0.11111111, %v264_v21  ;;  %v309_v7 = vmul.f32 0.11111111, %v272_v61  ;;  %v310_v12 = vmul.f32 0.11111111, %v280_v25 }
  0x64   :  { %v288_v13 = vadd.f32 %v287_v9, %v286_v18  ;;  %v296_v14 = vadd.f32 %v295_v63, %v294_v60  ;;  %v304_v16 = vadd.f32 %v303_v30, %v302_v8  ;;  %v322_v40 = vcombine.low %v306_v62, %v307_v5 }
  0x65   :  { %v323_v35 = vcombine.low %v308_v6, %v309_v7 }
  0x66   :  { %v311_v17 = vmul.f32 0.11111111, %v288_v13  ;;  %v312_v19 = vmul.f32 0.11111111, %v296_v14  ;;  %v313_v20 = vmul.f32 0.11111111, %v304_v16  ;;  %v332_v22 = vrot.slane %v322_v40, %v575_v29 }
  0x67   :  { %v339_v23 = vrot.slane %v323_v35, %v575_v29 }
  0x68   :  { %v324_v24 = vcombine.low %v310_v12, %v311_v17  ;;  %v325_v26 = vcombine.low %v312_v19, %v313_v20 }
  0x69   :  { %v354_v27 = vcombine.low %v332_v22, %v339_v23 }
  0x6a   :  { %v346_v28 = vrot.slane %v324_v24, %v575_v29  ;;  %v353_v31 = vrot.slane %v325_v26, %v575_v29 }
  0x6b   :  { %v362_v33 = vrot.slane %v354_v27, %v575_v29 }
  0x6c   :  { %v355_v32 = vcombine.low %v346_v28, %v353_v31 }
  0x6e   :  { %v369_v34 = vrot.slane %v355_v32, %v575_v29 }
  0x70   :  { %v370_v36 = vcombine.low %v362_v33, %v369_v34 }
  0x72   :  { %372 = vst [vmem:[#allocation5] sm:$0xff] %v370_v36 }
  0x73   :  { %504 = shalt.err (!%p501_p9)
}
  0x74   :  { %382 = dma.vmem_to_hbm [thread:$0]  %s380_s13, 128, %s627_s1, [#allocation4]  }
  0x75   :  { %515 = dma.done.wait [#allocation4], 128  }
  0x76   :  { %516 = vsyncadd [#allocation4], 4294967168 }
  0x77   :  { %386 = vsyncpa [#allocation3], 1 }
  0x78   :  { %387 = vsyncpa [#allocation4], 1 }

</bundles_post_ra>
